<compile_context>
chip_gen: v7x
topology: tpu7x:2x2x1
jax: 0.10.0
libtpu: 0.0.40
codegen_flags: <defaults>
</compile_context>

<pallas_src>
import math
import numpy as np
import jax
import jax.numpy as jnp
from jax.experimental import pallas as pl
from jax.experimental.pallas import tpu as pltpu


# ----------------------------------------------------------------------------
# PositionalEncoding1D buffer (constant given shapes; parameter-setup glue)
# ----------------------------------------------------------------------------
def positional_encoding_1d(seq_len: int, channels_orig: int) -> jnp.ndarray:
    """Matches PositionalEncoding1D.forward for a (B, seq_len, channels_orig)
    input; returns the (seq_len, channels_orig) encoding (batch-broadcast)."""
    channels = int(np.ceil(channels_orig / 2) * 2)
    inv_freq = 1.0 / (10000.0 ** (np.arange(0, channels, 2, dtype=np.float32) / channels))
    pos = np.arange(seq_len, dtype=np.float32)
    sin_inp = np.einsum("i,j->ij", pos, inv_freq)                  # (seq, ch/2)
    emb = np.stack((np.sin(sin_inp), np.cos(sin_inp)), axis=-1)    # interleave
    emb = emb.reshape(seq_len, channels)
    return jnp.asarray(emb[:, :channels_orig], dtype=jnp.float32)


# ----------------------------------------------------------------------------
# Pallas kernel: fused   (Linear -> ReLU -> +pos)* -> Linear
# ----------------------------------------------------------------------------
def _make_mlp_kernel(n_hidden: int, compute_dtype):
    def kernel(*refs):
        x_ref = refs[0]
        out_ref = refs[-1]
        p = refs[1:-1]            # [w1, b1, pe1, w2, b2, pe2, ..., wL, bL]
        h = x_ref[...].astype(compute_dtype)
        k = 0
        for _ in range(n_hidden):
            w = p[k][...]          # (d_in, hidden)  compute_dtype
            b = p[k + 1][...]      # (1, hidden)     f32, broadcasts over rows
            pe = p[k + 2][...]     # (tm, hidden)    f32, resident tile
            k += 3
            z = jnp.dot(h, w, preferred_element_type=jnp.float32) + b
            z = jnp.maximum(z, 0.0) + pe              # ReLU, then x += pos_enc(x)
            h = z.astype(compute_dtype)
        w = p[k][...]
        b = p[k + 1][...]
        out_ref[...] = (jnp.dot(h, w, preferred_element_type=jnp.float32) + b
                        ).astype(out_ref.dtype)

    return kernel


# ----------------------------------------------------------------------------
# Row-tile selection: tm must be a multiple of C (PE alignment) and of 8
# (sublane granularity); aim at ~target_rows rows per grid step.
# ----------------------------------------------------------------------------
def _choose_tm(M: int, C: int, target_rows: int = 1024) -> int:
    B = M // C
    m = 8 // math.gcd(C, 8)                   # smallest k with (k*C) % 8 == 0
    k0 = max(1, -(-target_rows // C))         # ceil(target / C)
    k = -(-k0 // m) * m                       # round up to multiple of m
    k_cap = -(-B // m) * m                    # no more periods than needed
    k = max(m, min(k, k_cap))
    return k * C


# ----------------------------------------------------------------------------
# Wrapper
# ----------------------------------------------------------------------------
def pos_mlp_refiner(x, params, pes, *, tm=None, target_rows=1024,
                    compute_dtype=jnp.bfloat16):
    """x: (B, C, D).
    params: list of (w, b) with w (d_in, d_out), b (1, d_out) or (d_out,);
            last pair is the output Linear, earlier pairs are hidden Linears
            (each followed by ReLU + positional-encoding add).
    pes:    list of (C, hidden_i) positional-encoding buffers, one per hidden.
    """
    B, C, D = x.shape
    M = B * C
    n_hidden = len(pes)
    out_dim = params[-1][0].shape[1]

    if tm is None:
        tm = _choose_tm(M, C, target_rows)
    assert tm % C == 0 and tm % 8 == 0, (tm, C)

    m_pad = pl.cdiv(M, tm) * tm
    n_tiles = m_pad // tm
    reps = tm // C

    # Flatten rows, pad the remainder, stream activations in compute_dtype.
    xf = x.reshape(M, D)
    if m_pad != M:
        xf = jnp.pad(xf, ((0, m_pad - M), (0, 0)))
    xf = xf.astype(compute_dtype)

    inputs = [xf]
    in_specs = [pl.BlockSpec((tm, D), lambda i: (i, 0))]
    for li in range(n_hidden):
        w, b = params[li]
        hid = w.shape[1]
        # One period-aligned PE tile per hidden layer -- only (tm, hidden),
        # resident in VMEM for the whole grid (constant block index).
        pe_tile = jnp.tile(pes[li].astype(jnp.float32), (reps, 1))
        inputs += [w.astype(compute_dtype),
                   jnp.asarray(b, jnp.float32).reshape(1, hid),
                   pe_tile]
        in_specs += [
            pl.BlockSpec(w.shape, lambda i: (0, 0)),
            pl.BlockSpec((1, hid), lambda i: (0, 0)),
            pl.BlockSpec((tm, hid), lambda i: (0, 0)),
        ]
    w_out, b_out = params[-1]
    inputs += [w_out.astype(compute_dtype),
               jnp.asarray(b_out, jnp.float32).reshape(1, out_dim)]
    in_specs += [
        pl.BlockSpec(w_out.shape, lambda i: (0, 0)),
        pl.BlockSpec((1, out_dim), lambda i: (0, 0)),
    ]

    out = pl.pallas_call(
        _make_mlp_kernel(n_hidden, compute_dtype),
        out_shape=jax.ShapeDtypeStruct((m_pad, out_dim), x.dtype),
        grid_spec=pltpu.PrefetchScalarGridSpec(
            num_scalar_prefetch=0,
            grid=(n_tiles,),
            in_specs=in_specs,
            out_specs=pl.BlockSpec((tm, out_dim), lambda i: (i, 0)),
        ),
        compiler_params=pltpu.CompilerParams(
            dimension_semantics=("parallel",),
            # generous vs. the tiny tiles here; raises v5e's 16 MiB default,
            # no-op on v6e/v7x (32 MiB scoped default).
            vmem_limit_bytes=32 * 1024 * 1024,
        ),
    )(*inputs)
    return out[:M].reshape(B, C, out_dim)


# ----------------------------------------------------------------------------
# Pure-JAX f32 reference (mirrors the PyTorch forward exactly)
# ----------------------------------------------------------------------------
def reference(x, params, pes):
    B, C, D = x.shape
    h = x.reshape(B * C, D).astype(jnp.float32)
    for (w, b), pe in zip(params[:-1], pes):
        h = jnp.maximum(h @ w + jnp.reshape(b, (-1,)), 0.0)
        h = h + jnp.tile(pe, (B, 1))
    w, b = params[-1]
    h = h @ w + jnp.reshape(b, (-1,))
    return h.reshape(B, C, -1)


# ----------------------------------------------------------------------------
if __name__ == "__main__":
    # Small shapes consistent with the module: x is (B, C, in_dim).
    B, C = 2, 16
    in_dim, out_dim = 4, 3
    hidden_list = [32, 32]

    key = jax.random.PRNGKey(0)
    keys = jax.random.split(key, 2 * (len(hidden_list) + 1) + 2)

    # Deterministic synthetic parameters (nn.Linear weight/bias, stored
    # transposed as (d_in, d_out) for y = x @ W + b).
    params = []
    kidx = 0
    lastv = in_dim
    for hidden in hidden_list:
        w = 0.1 * jax.random.normal(keys[kidx], (lastv, hidden), jnp.float32)
        b = 0.1 * jax.random.normal(keys[kidx + 1], (1, hidden), jnp.float32)
        params.append((w, b))
        kidx += 2
        lastv = hidden
    w = 0.1 * jax.random.normal(keys[kidx], (lastv, out_dim), jnp.float32)
    b = 0.1 * jax.random.normal(keys[kidx + 1], (1, out_dim), jnp.float32)
    params.append((w, b))
    kidx += 2

    # Positional encoding buffers (one per hidden layer), seq axis = C.
    pes = [positional_encoding_1d(C, h) for h in hidden_list]

    x = jax.random.normal(keys[kidx], (B, C, in_dim), jnp.float32)
    y_ref = jax.block_until_ready(reference(x, params, pes))

    # 1) f32 path: exact structural check against the reference.
    y_f32 = jax.block_until_ready(
        pos_mlp_refiner(x, params, pes, compute_dtype=jnp.float32))
    assert y_f32.shape == (B, C, out_dim)
    assert np.allclose(np.asarray(y_f32), np.asarray(y_ref), rtol=1e-5, atol=1e-5)

    # 2) default bf16-streaming path (f32 accumulation): loose tolerance.
    y_bf16 = jax.block_until_ready(pos_mlp_refiner(x, params, pes))
    assert y_bf16.shape == (B, C, out_dim)
    assert np.allclose(np.asarray(y_bf16), np.asarray(y_ref), rtol=5e-2, atol=5e-2)

    # 3) remainder / multi-step-grid path: M not a multiple of the row tile.
    kidx += 1
    x2 = jax.random.normal(keys[kidx], (5, C, in_dim), jnp.float32)   # M = 80
    y2 = jax.block_until_ready(
        pos_mlp_refiner(x2, params, pes, tm=32, compute_dtype=jnp.float32))
    y2_ref = jax.block_until_ready(reference(x2, params, pes))
    assert y2.shape == (5, C, out_dim)
    assert np.allclose(np.asarray(y2), np.asarray(y2_ref), rtol=1e-5, atol=1e-5)

    print("KERNEL_OK")
</pallas_src>

<mosaic_0001>
module attributes {stable_mosaic.version = 11 : i64} {
  func.func @kernel(%arg0: i32, %arg1: memref<32x4xf32, #tpu.memory_space<vmem>>, %arg2: memref<4x32xf32, #tpu.memory_space<vmem>>, %arg3: memref<1x32xf32, #tpu.memory_space<vmem>>, %arg4: memref<32x32xf32, #tpu.memory_space<vmem>>, %arg5: memref<32x32xf32, #tpu.memory_space<vmem>>, %arg6: memref<1x32xf32, #tpu.memory_space<vmem>>, %arg7: memref<32x32xf32, #tpu.memory_space<vmem>>, %arg8: memref<32x3xf32, #tpu.memory_space<vmem>>, %arg9: memref<1x3xf32, #tpu.memory_space<vmem>>, %arg10: memref<32x3xf32, #tpu.memory_space<vmem>>) attributes {dimension_semantics = [#tpu.dimension_semantics<parallel>], iteration_bounds = array<i64: 1>, scalar_prefetch = 0 : i64, scratch_operands = 0 : i64, tpu.core_type = #tpu.core_type<tc>, window_params = [{transform_indices = @transform_0, window_bounds = array<i64: 32, 4>}, {pipeline_mode = #tpu.pipeline_mode<synchronous>, transform_indices = @transform_1, window_bounds = array<i64: 4, 32>}, {pipeline_mode = #tpu.pipeline_mode<synchronous>, transform_indices = @transform_2, window_bounds = array<i64: 1, 32>}, {pipeline_mode = #tpu.pipeline_mode<synchronous>, transform_indices = @transform_3, window_bounds = array<i64: 32, 32>}, {pipeline_mode = #tpu.pipeline_mode<synchronous>, transform_indices = @transform_4, window_bounds = array<i64: 32, 32>}, {pipeline_mode = #tpu.pipeline_mode<synchronous>, transform_indices = @transform_5, window_bounds = array<i64: 1, 32>}, {pipeline_mode = #tpu.pipeline_mode<synchronous>, transform_indices = @transform_6, window_bounds = array<i64: 32, 32>}, {pipeline_mode = #tpu.pipeline_mode<synchronous>, transform_indices = @transform_7, window_bounds = array<i64: 32, 3>}, {pipeline_mode = #tpu.pipeline_mode<synchronous>, transform_indices = @transform_8, window_bounds = array<i64: 1, 3>}, {transform_indices = @transform_9, window_bounds = array<i64: 32, 3>}]} {
    %c0 = arith.constant 0 : index
    %c0_0 = arith.constant 0 : index
    %0 = vector.load %arg1[%c0, %c0_0] : memref<32x4xf32, #tpu.memory_space<vmem>>, vector<32x4xf32>
    %c0_1 = arith.constant 0 : index
    %c0_2 = arith.constant 0 : index
    %1 = vector.load %arg2[%c0_1, %c0_2] : memref<4x32xf32, #tpu.memory_space<vmem>>, vector<4x32xf32>
    %c0_3 = arith.constant 0 : index
    %c0_4 = arith.constant 0 : index
    %2 = vector.load %arg3[%c0_3, %c0_4] : memref<1x32xf32, #tpu.memory_space<vmem>>, vector<1x32xf32>
    %c0_5 = arith.constant 0 : index
    %c0_6 = arith.constant 0 : index
    %3 = vector.load %arg4[%c0_5, %c0_6] : memref<32x32xf32, #tpu.memory_space<vmem>>, vector<32x32xf32>
    %cst = arith.constant dense<0.000000e+00> : vector<32x32xf32>
    %4 = tpu.matmul %0, %1, %cst {dimension_numbers = #tpu.dot_dimension_numbers<[1], [0], [0], [1], [0, 0, 1, 1], [], []>} : vector<32x4xf32>, vector<4x32xf32>, vector<32x32xf32> -> vector<32x32xf32>
    %5 = vector.broadcast %2 : vector<1x32xf32> to vector<32x32xf32>
    %6 = arith.addf %4, %5 : vector<32x32xf32>
    %cst_7 = arith.constant 0.000000e+00 : f32
    %7 = vector.broadcast %cst_7 : f32 to vector<32x32xf32>
    %8 = arith.maximumf %6, %7 : vector<32x32xf32>
    %9 = arith.addf %8, %3 : vector<32x32xf32>
    %c0_8 = arith.constant 0 : index
    %c0_9 = arith.constant 0 : index
    %10 = vector.load %arg5[%c0_8, %c0_9] : memref<32x32xf32, #tpu.memory_space<vmem>>, vector<32x32xf32>
    %c0_10 = arith.constant 0 : index
    %c0_11 = arith.constant 0 : index
    %11 = vector.load %arg6[%c0_10, %c0_11] : memref<1x32xf32, #tpu.memory_space<vmem>>, vector<1x32xf32>
    %c0_12 = arith.constant 0 : index
    %c0_13 = arith.constant 0 : index
    %12 = vector.load %arg7[%c0_12, %c0_13] : memref<32x32xf32, #tpu.memory_space<vmem>>, vector<32x32xf32>
    %cst_14 = arith.constant dense<0.000000e+00> : vector<32x32xf32>
    %13 = tpu.matmul %9, %10, %cst_14 {dimension_numbers = #tpu.dot_dimension_numbers<[1], [0], [0], [1], [0, 0, 1, 1], [], []>} : vector<32x32xf32>, vector<32x32xf32>, vector<32x32xf32> -> vector<32x32xf32>
    %14 = vector.broadcast %11 : vector<1x32xf32> to vector<32x32xf32>
    %15 = arith.addf %13, %14 : vector<32x32xf32>
    %cst_15 = arith.constant 0.000000e+00 : f32
    %16 = vector.broadcast %cst_15 : f32 to vector<32x32xf32>
    %17 = arith.maximumf %15, %16 : vector<32x32xf32>
    %18 = arith.addf %17, %12 : vector<32x32xf32>
    %c0_16 = arith.constant 0 : index
    %c0_17 = arith.constant 0 : index
    %19 = vector.load %arg8[%c0_16, %c0_17] : memref<32x3xf32, #tpu.memory_space<vmem>>, vector<32x3xf32>
    %c0_18 = arith.constant 0 : index
    %c0_19 = arith.constant 0 : index
    %20 = vector.load %arg9[%c0_18, %c0_19] : memref<1x3xf32, #tpu.memory_space<vmem>>, vector<1x3xf32>
    %cst_20 = arith.constant dense<0.000000e+00> : vector<32x3xf32>
    %21 = tpu.matmul %18, %19, %cst_20 {dimension_numbers = #tpu.dot_dimension_numbers<[1], [0], [0], [1], [0, 0, 1, 1], [], []>} : vector<32x32xf32>, vector<32x3xf32>, vector<32x3xf32> -> vector<32x3xf32>
    %22 = vector.broadcast %20 : vector<1x3xf32> to vector<32x3xf32>
    %23 = arith.addf %21, %22 : vector<32x3xf32>
    %c0_21 = arith.constant 0 : index
    %c0_22 = arith.constant 0 : index
    %24 = vector.load %arg10[%c0_21, %c0_22] : memref<32x3xf32, #tpu.memory_space<vmem>>, vector<32x3xf32>
    tpu.vector_store %arg10[%c0_21, %c0_22], %23 {strides = array<i32>} : memref<32x3xf32, #tpu.memory_space<vmem>>, vector<32x3xf32>,
    return
  }
  func.func @transform_0(%arg0: i32) -> (i32, i32) {
    %c0_i32 = arith.constant 0 : i32
    %c0_i32_0 = arith.constant 0 : i32
    return %arg0, %c0_i32 : i32, i32
  }
  func.func @transform_1(%arg0: i32) -> (i32, i32) {
    %c0_i32 = arith.constant 0 : i32
    %c0_i32_0 = arith.constant 0 : i32
    %c0_i32_1 = arith.constant 0 : i32
    return %c0_i32, %c0_i32_0 : i32, i32
  }
  func.func @transform_2(%arg0: i32) -> (i32, i32) {
    %c0_i32 = arith.constant 0 : i32
    %c0_i32_0 = arith.constant 0 : i32
    %c0_i32_1 = arith.constant 0 : i32
    return %c0_i32, %c0_i32_0 : i32, i32
  }
  func.func @transform_3(%arg0: i32) -> (i32, i32) {
    %c0_i32 = arith.constant 0 : i32
    %c0_i32_0 = arith.constant 0 : i32
    %c0_i32_1 = arith.constant 0 : i32
    return %c0_i32, %c0_i32_0 : i32, i32
  }
  func.func @transform_4(%arg0: i32) -> (i32, i32) {
    %c0_i32 = arith.constant 0 : i32
    %c0_i32_0 = arith.constant 0 : i32
    %c0_i32_1 = arith.constant 0 : i32
    return %c0_i32, %c0_i32_0 : i32, i32
  }
  func.func @transform_5(%arg0: i32) -> (i32, i32) {
    %c0_i32 = arith.constant 0 : i32
    %c0_i32_0 = arith.constant 0 : i32
    %c0_i32_1 = arith.constant 0 : i32
    return %c0_i32, %c0_i32_0 : i32, i32
  }
  func.func @transform_6(%arg0: i32) -> (i32, i32) {
    %c0_i32 = arith.constant 0 : i32
    %c0_i32_0 = arith.constant 0 : i32
    %c0_i32_1 = arith.constant 0 : i32
    return %c0_i32, %c0_i32_0 : i32, i32
  }
  func.func @transform_7(%arg0: i32) -> (i32, i32) {
    %c0_i32 = arith.constant 0 : i32
    %c0_i32_0 = arith.constant 0 : i32
    %c0_i32_1 = arith.constant 0 : i32
    return %c0_i32, %c0_i32_0 : i32, i32
  }
  func.func @transform_8(%arg0: i32) -> (i32, i32) {
    %c0_i32 = arith.constant 0 : i32
    %c0_i32_0 = arith.constant 0 : i32
    %c0_i32_1 = arith.constant 0 : i32
    return %c0_i32, %c0_i32_0 : i32, i32
  }
  func.func @transform_9(%arg0: i32) -> (i32, i32) {
    %c0_i32 = arith.constant 0 : i32
    %c0_i32_0 = arith.constant 0 : i32
    return %arg0, %c0_i32 : i32, i32
  }
}

</mosaic_0001>

<bundles_post_ra>
// kernel: tpu_custom_call.1
= control target key start
LH: loop header
LB: loop body
LE: loop exit
PB: predicated region body
PF: predicated region fallthrough
CT: control target
= control target key end

     0   :  { %14 = vsyncpa [#allocation3], 0  ;;  %s527_s30 = smov [#allocation2]   ;;  %s672_s0 = inlined_call_operand.vmem [shape: f32[32,4], index: 0, kind: input, shape index: {}]   ;;  %s673_s1 = inlined_call_operand.vmem [shape: f32[4,32], index: 1, kind: input, shape index: {}]   ;;  %s674_s2 = inlined_call_operand.vmem [shape: f32[1,32], index: 2, kind: input, shape index: {}]   ;;  %s675_s3 = inlined_call_operand.vmem [shape: f32[32,32], index: 3, kind: input, shape index: {}]   ;;  %s676_s4 = inlined_call_operand.vmem [shape: f32[32,32], index: 4, kind: input, shape index: {}]   ;;  %s677_s5 = inlined_call_operand.vmem [shape: f32[1,32], index: 5, kind: input, shape index: {}]   ;;  %s678_s6 = inlined_call_operand.hbm [shape: f32[32,32], index: 6, kind: input, shape index: {}]   ;;  %s679_s7 = inlined_call_operand.vmem [shape: f32[32,3], index: 7, kind: input, shape index: {}]   ;;  %s680_s8 = inlined_call_operand.vmem [shape: f32[1,3], index: 8, kind: input, shape index: {}]   ;;  %s681_s9 = inlined_call_operand.vmem [shape: f32[32,3], index: 9, kind: output, shape index: {}]  }
   0x1   :  { %s32_s10 = sshll.u32 %s527_s30, 4  ;;  %s503_s13 = scalar_lea.hbm %s678_s6, 512  ;;  %s33_s10 = int_to_ptr.vmem [resolvable:$true] %s32_s10 }
   0x2   :  { %p504_p0 = scmp.ne.s32.totalorder %s678_s6, %s503_s13  ;;  %p507_p1 = scmp.lt.u32.totalorder %s503_s13, %s678_s6 }
   0x4   :  { %p509_p2 = pnand %p507_p1, %p504_p0 }
   0x6   :  { %512 = shalt.err (!%p509_p2)
}
   0x7   :  { %s513_s18 = scalar_lea.vmem %s33_s10, 512  ;;  %p518_p4 = scmp.lt.s32.totalorder %s33_s10, %s33_s10 }
   0x8   :  { %p514_p3 = scmp.ne.s32.totalorder %s33_s10, %s513_s18  ;;  %p519_p5 = scmp.lt.s32.totalorder %s513_s18, %s513_s18 }
   0xa   :  { %p520_p6 = por %p519_p5, %p518_p4 }
   0xc   :  { %p521_p7 = pnand %p520_p6, %p514_p3 }
   0xe   :  { %524 = shalt.err (!%p521_p7)
}
   0xf   :  { %s528_s19 = smov 128   ;;  %s529_s20 = smov 8  }
  0x10   :  { %38 = dma.hbm_to_vmem [thread:$0]  %s678_s6, 512, %s33_s10, [#allocation3], %s528_s19, %s528_s19, %s529_s20  }
  0x11   :  { %525 = dma.done.wait [#allocation3], 512  }
  0x12   :  { %526 = vsyncadd [#allocation3], 4294966784  ;;  %vm75_vm0 = vcmask 1043456   ;;  %vm62_vm1 = vcmask 31744   ;;  %v50_v0 = vld [vmem:[%s673_s1] sm:$0xf] }
  0x13   :  { %v46_v1 = vld [vmem:[%s672_s0] sm:$0xff]  ;;  %v47_v2 = vld [vmem:[%s672_s0 + $0x8] sm:$0xff]  ;;  %448 = vmatprep.subr.msk.mxu0 %vm75_vm0, %v50_v0  ;;  %v48_v3 = vld [vmem:[%s672_s0 + $0x10] sm:$0xff]  ;;  %vm187_vm2 = vcmask 261120   ;;  %vm401_vm3 = vcmask 23552  }
  0x14   :  { %450 = vmatprep.mubr.msk.f32.mxu0 %vm62_vm1, %v46_v1  ;;  %449 = vmatpush3.msk.msra.mxu0 %vm75_vm0, %v50_v0  ;;  %v49_v4 = vld [vmem:[%s672_s0 + $0x18] sm:$0xff]  ;;  %v172_v5 = vld [vmem:[%s676_s4] sm:$0xff]  ;;  %v173_v6 = vld [vmem:[%s676_s4 + $0x8] sm:$0xff] }
  0x15   :  { %451 = vmatmul.mubr.msk.f32.vlgmr.msra.gmra.mrb[0].mxu0 %vm62_vm1, %v47_v2  ;;  %v484_v7 = vpack.c.bf16 %v173_v6, %v172_v5  ;;  %v174_v8 = vld [vmem:[%s676_s4 + $0x10] sm:$0xff]  ;;  %v175_v9 = vld [vmem:[%s676_s4 + $0x18] sm:$0xff]  ;;  %v411_v11 = vld [vmem:[%s674_s2] ss:$0 sm:$0xff] }
  0x16   :  { %453 = vmatprep.mubr.msk.f32.mxu0 %vm62_vm1, %v48_v3  ;;  %v488_v10 = vpack.c.bf16 %v175_v9, %v174_v8  ;;  %v52_v17 = vld [vmem:[%s675_s3] sm:$0xff]  ;;  %v53_v18 = vld [vmem:[%s675_s3 + $0x8] sm:$0xff]  ;;  %v54_v27 = vld [vmem:[%s675_s3 + $0x10] sm:$0xff] }
  0x17   :  { %485 = vmatprep.subr.bf16.mxu1 %v484_v7  ;;  %v55_v28 = vld [vmem:[%s675_s3 + $0x18] sm:$0xff]  ;;  %v293_v32 = vld [vmem:[%s679_s7] sm:$0xff]  ;;  %v294_v33 = vld [vmem:[%s679_s7 + $0x8] sm:$0xff] }
  0x18   :  { %487 = vmatpush3.bf16.msra.mxu1 %v484_v7  ;;  %v492_v34 = vpack.c.bf16 %v294_v33, %v293_v32  ;;  %v295_v35 = vld [vmem:[%s679_s7 + $0x10] sm:$0xff]  ;;  %v296_v36 = vld [vmem:[%s679_s7 + $0x18] sm:$0xff]  ;;  %v417_v38 = vld [vmem:[%s677_s5] ss:$0 sm:$0xff] }
  0x19   :  { %454 = vmatmul.mubr.msk.f32.gmra.mrb[2].mxu0 %vm62_vm1, %v49_v4  ;;  %489 = vmatprep.subr.bf16.mxu1 %v488_v10  ;;  %v496_v37 = vpack.c.bf16 %v296_v36, %v295_v35  ;;  %v177_v44 = vld [vmem:[#allocation2] sm:$0xff]  ;;  %v178_v45 = vld [vmem:[#allocation2 + $0x8] sm:$0xff]  ;;  %v179_v54 = vld [vmem:[#allocation2 + $0x10] sm:$0xff] }
  0x1a   :  { %493 = vmatprep.subr.bf16.mxu0 %v492_v34  ;;  %v180_v55 = vld [vmem:[#allocation2 + $0x18] sm:$0xff]  ;;  %v422_v59 = vld [vmem:[%s680_s8] ss:$0 sm:$0xff] }
  0x1b   :  { %495 = vmatpush3.bf16.msra.mxu0 %v492_v34 }
  0x1c   :  { %491 = vmatpush3.bf16.msra.mxu1 %v488_v10  ;;  %497 = vmatprep.subr.bf16.mxu0 %v496_v37 }
  0x1f   :  { %499 = vmatpush3.bf16.msra.mxu0 %v496_v37 }
  0xe8   :  { %v452_v12 = vpop.f32.mrb[0].mxu0 }
  0xe9   :  { %v151_v13 = vadd.f32 %v452_v12, %v411_v11  ;;  %v145_v14 = vpop.f32.mrb[1].mxu0 }
  0xea   :  { %v146_v15 = vadd.f32 %v411_v11, %v145_v14 }
  0xeb   :  { %v165_v16 = vmax.f32 %v151_v13, 0.0 }
  0xec   :  { %v164_v19 = vmax.f32 %v146_v15, 0.0  ;;  %v455_v20 = vpop.f32.mrb[2].mxu0 }
  0xed   :  { %v161_v21 = vadd.f32 %v455_v20, %v411_v11  ;;  %v155_v22 = vpop.f32.mrb[3].mxu0  ;;  %v169_v25 = vadd.f32 %v165_v16, %v53_v18 }
  0xee   :  { %v156_v23 = vadd.f32 %v411_v11, %v155_v22  ;;  %v168_v24 = vadd.f32 %v164_v19, %v52_v17 }
  0xef   :  { %v167_v26 = vmax.f32 %v161_v21, 0.0 }
  0xf0   :  { %v166_v29 = vmax.f32 %v156_v23, 0.0  ;;  %464 = vmatprep.mubr.msk.f32.mxu1 %vm187_vm2, %v168_v24 }
  0xf1   :  { %465 = vmatmul.mubr.msk.f32.vlgmr.msra.gmra.mrb[0].mxu1 %vm187_vm2, %v169_v25  ;;  %v171_v31 = vadd.f32 %v167_v26, %v55_v28 }
  0xf2   :  { %v170_v30 = vadd.f32 %v166_v29, %v54_v27 }
  0xf4   :  { %467 = vmatprep.mubr.msk.f32.mxu1 %vm187_vm2, %v170_v30 }
  0xf5   :  { %468 = vmatmul.mubr.msk.f32.gmra.mrb[2].mxu1 %vm187_vm2, %v171_v31 }
 0x1c4   :  { %v466_v39 = vpop.f32.mrb[0].mxu1 }
 0x1c5   :  { %v272_v40 = vadd.f32 %v466_v39, %v417_v38  ;;  %v266_v41 = vpop.f32.mrb[1].mxu1 }
 0x1c6   :  { %v267_v42 = vadd.f32 %v417_v38, %v266_v41 }
 0x1c7   :  { %v286_v43 = vmax.f32 %v272_v40, 0.0 }
 0x1c8   :  { %v285_v46 = vmax.f32 %v267_v42, 0.0  ;;  %v469_v47 = vpop.f32.mrb[2].mxu1 }
 0x1c9   :  { %v282_v48 = vadd.f32 %v469_v47, %v417_v38  ;;  %v276_v49 = vpop.f32.mrb[3].mxu1  ;;  %v290_v52 = vadd.f32 %v286_v43, %v178_v45 }
 0x1ca   :  { %v289_v50 = vadd.f32 %v285_v46, %v177_v44  ;;  %v277_v51 = vadd.f32 %v417_v38, %v276_v49 }
 0x1cb   :  { %v288_v53 = vmax.f32 %v282_v48, 0.0 }
 0x1cc   :  { %v287_v56 = vmax.f32 %v277_v51, 0.0  ;;  %478 = vmatprep.mubr.msk.f32.mxu0 %vm187_vm2, %v289_v50 }
 0x1cd   :  { %479 = vmatmul.mubr.msk.f32.vlgmr.msra.gmra.mrb[4].mxu0 %vm187_vm2, %v290_v52  ;;  %v292_v58 = vadd.f32 %v288_v53, %v180_v55 }
 0x1ce   :  { %v291_v57 = vadd.f32 %v287_v56, %v179_v54 }
 0x1d0   :  { %481 = vmatprep.mubr.msk.f32.mxu0 %vm187_vm2, %v291_v57 }
 0x1d1   :  { %482 = vmatmul.mubr.msk.f32.gmra.mrb[6].mxu0 %vm187_vm2, %v292_v58 }
 0x2a0   :  { %v480_v60 = vpop.f32.mrb[4].mxu0 }
 0x2a1   :  { %v388_v61 = vadd.f32 %v480_v60, %v422_v59  ;;  %v382_v62 = vpop.f32.mrb[5].mxu0 }
 0x2a2   :  { %v383_v63 = vadd.f32 %v422_v59, %v382_v62 }
 0x2a3   :  { %403 = vst.msk [vmem:[%s681_s9 + $0x8] sm:$0xff] %vm401_vm3, %v388_v61 }
 0x2a4   :  { %402 = vst.msk [vmem:[%s681_s9] sm:$0xff] %vm401_vm3, %v383_v63  ;;  %v483_v0 = vpop.f32.mrb[6].mxu0 }
 0x2a5   :  { %v398_v1 = vadd.f32 %v483_v0, %v422_v59  ;;  %v392_v2 = vpop.f32.mrb[7].mxu0 }
 0x2a6   :  { %v393_v3 = vadd.f32 %v422_v59, %v392_v2 }
 0x2a7   :  { %405 = vst.msk [vmem:[%s681_s9 + $0x18] sm:$0xff] %vm401_vm3, %v398_v1 }
 0x2a8   :  { %404 = vst.msk [vmem:[%s681_s9 + $0x10] sm:$0xff] %vm401_vm3, %v393_v3 }
 0x2a9   :  { %410 = vsyncpa [#allocation3], 1 }

</bundles_post_ra>
